<compile_context>
chip_gen: v6e
topology: v6e:2x2x1
jax: 0.10.0
libtpu: 0.0.40
codegen_flags: <defaults>
</compile_context>

<pallas_src>
import jax
import jax.numpy as jnp
from jax.experimental import pallas as pl
from jax.experimental.pallas import tpu as pltpu


def _sigmoid(v):
    # Explicit formula (exp is guaranteed to lower via EUP); used by both the
    # kernel and the reference so numerics match.
    return 1.0 / (1.0 + jnp.exp(-v))


# ---------------------------------------------------------------------------
# Fused Pallas kernel: per grid step = one token through all GRU layers.
# ---------------------------------------------------------------------------
def _make_encoder_kernel(num_layers, hidden_size):
    H = hidden_size

    def kernel(tok_ref, h0_ref, emb_ref, *args):
        # args = (w_x0, w_h0, b_x0, b_h0, ..., out_ref, hout_ref)
        out_ref = args[4 * num_layers]
        hout_ref = args[4 * num_layers + 1]
        t = pl.program_id(0)

        # Initialize the carried hidden state once.  It lives in the resident
        # hidden-output block (constant index_map), aliased with the input.
        @pl.when(t == 0)
        def _():
            hout_ref[...] = h0_ref[...]

        tok = tok_ref[t]                      # scalar int32 from SMEM
        x = emb_ref[tok]                      # (1, E) bf16 gather from VMEM table

        h_new = None
        for l in range(num_layers):
            w_x = args[4 * l + 0]             # (in, 3H) bf16, cols [r | z | n]
            w_h = args[4 * l + 1]             # (H,  3H) bf16, cols [r | z | n]
            b_x = args[4 * l + 2]             # (1, 3H) f32
            b_h = args[4 * l + 3]             # (1, 3H) f32
            h = hout_ref[l]                   # (1, H) f32 carried state

            gi = jnp.dot(x, w_x[...],
                         preferred_element_type=jnp.float32) + b_x[...]
            gh = jnp.dot(h.astype(jnp.bfloat16), w_h[...],
                         preferred_element_type=jnp.float32) + b_h[...]

            r = _sigmoid(gi[:, :H] + gh[:, :H])
            z = _sigmoid(gi[:, H:2 * H] + gh[:, H:2 * H])
            n = jnp.tanh(gi[:, 2 * H:] + r * gh[:, 2 * H:])
            h_new = (1.0 - z) * n + z * h     # (1, H) f32

            hout_ref[l] = h_new               # update carry
            x = h_new.astype(jnp.bfloat16)    # input to next layer

        out_ref[t] = h_new                    # top-layer output for step t

    return kernel


# ---------------------------------------------------------------------------
# Wrapper: mirrors Encoder.forward (seq_len=1 is exactly the PyTorch forward;
# longer sequences are the same recurrence carried across steps).
# ---------------------------------------------------------------------------
def encoder_forward(params, tokens, hidden):
    emb = params["embedding"]                 # (V, 1, E) bf16
    V, _, E = emb.shape
    L, _, H = hidden.shape
    layers = params["layers"]

    tokens = jnp.reshape(jnp.asarray(tokens, jnp.int32), (-1,))
    T = int(tokens.shape[0])

    in_specs = [
        pl.BlockSpec(memory_space=pltpu.MemorySpace.SMEM),   # token ids
        pl.BlockSpec((L, 1, H), lambda t: (0, 0, 0)),        # initial hidden
        pl.BlockSpec((V, 1, E), lambda t: (0, 0, 0)),        # embedding table
    ]
    flat_w = []
    for (w_x, w_h, b_x, b_h) in layers:
        for a in (w_x, w_h, b_x, b_h):
            flat_w.append(a)
            in_specs.append(pl.BlockSpec(a.shape, lambda t: (0, 0)))

    out_specs = (
        pl.BlockSpec((T, 1, H), lambda t: (0, 0, 0)),        # per-step outputs
        pl.BlockSpec((L, 1, H), lambda t: (0, 0, 0)),        # final hidden
    )
    out_shape = (
        jax.ShapeDtypeStruct((T, 1, H), jnp.float32),
        jax.ShapeDtypeStruct((L, 1, H), jnp.float32),
    )

    kernel = _make_encoder_kernel(L, H)
    out, hid = pl.pallas_call(
        kernel,
        grid=(T,),
        in_specs=in_specs,
        out_specs=out_specs,
        out_shape=out_shape,
        # inputs: 0=tokens, 1=hidden, 2=emb, 3..=weights ; outputs: 0=out, 1=hid
        input_output_aliases={1: 1},
        compiler_params=pltpu.CompilerParams(
            dimension_semantics=("arbitrary",)),   # recurrent axis: never parallel
    )(tokens, hidden, emb, *flat_w)
    return out, hid


# ---------------------------------------------------------------------------
# Parameter init (deterministic, PyTorch-style): embedding ~ N(0,1);
# GRU weights/biases ~ U(-1/sqrt(H), 1/sqrt(H)), gate order r, z, n.
# ---------------------------------------------------------------------------
def init_params(key, input_size, embedding_size, hidden_size, num_layers):
    keys = jax.random.split(key, 1 + num_layers)
    H = hidden_size
    k = 1.0 / float(H) ** 0.5

    emb_f32 = jax.random.normal(keys[0], (input_size, embedding_size), jnp.float32)
    emb = emb_f32.reshape(input_size, 1, embedding_size).astype(jnp.bfloat16)

    layers = []       # packed params fed to the kernel (bf16 weights, f32 biases)
    raw_layers = []   # PyTorch-layout params for the pure-JAX reference
    for l in range(num_layers):
        in_size = embedding_size if l == 0 else hidden_size
        lk = jax.random.split(keys[1 + l], 4)
        w_ih = jax.random.uniform(lk[0], (3 * H, in_size), jnp.float32, -k, k)
        w_hh = jax.random.uniform(lk[1], (3 * H, H), jnp.float32, -k, k)
        b_ih = jax.random.uniform(lk[2], (3 * H,), jnp.float32, -k, k)
        b_hh = jax.random.uniform(lk[3], (3 * H,), jnp.float32, -k, k)

        w_x = w_ih.T.astype(jnp.bfloat16)     # (in, 3H), columns [r | z | n]
        w_h = w_hh.T.astype(jnp.bfloat16)     # (H,  3H), columns [r | z | n]
        b_x = b_ih.reshape(1, 3 * H)          # f32
        b_h = b_hh.reshape(1, 3 * H)          # f32

        layers.append((w_x, w_h, b_x, b_h))
        raw_layers.append((w_ih, w_hh, b_ih, b_hh))

    return {"embedding": emb, "layers": layers, "raw_layers": raw_layers}


# ---------------------------------------------------------------------------
# Pure-JAX reference: per-token Encoder.forward loop (PyTorch GRU equations),
# built from the raw PyTorch-layout weights, mirroring the bf16 matmul inputs.
# ---------------------------------------------------------------------------
def encoder_forward_ref(params, tokens, hidden):
    emb = params["embedding"]                 # (V, 1, E) bf16
    tokens = jnp.reshape(jnp.asarray(tokens, jnp.int32), (-1,))
    L, _, H = hidden.shape

    h = hidden
    outs = []
    for t in range(int(tokens.shape[0])):
        x = emb[tokens[t]].reshape(1, -1)     # (1, E) bf16
        new_h = []
        for l in range(L):
            w_ih, w_hh, b_ih, b_hh = params["raw_layers"][l]
            hl = h[l]
            gi = jnp.dot(x.astype(jnp.bfloat16), w_ih.T.astype(jnp.bfloat16),
                         preferred_element_type=jnp.float32) + b_ih.reshape(1, -1)
            gh = jnp.dot(hl.astype(jnp.bfloat16), w_hh.T.astype(jnp.bfloat16),
                         preferred_element_type=jnp.float32) + b_hh.reshape(1, -1)
            r = _sigmoid(gi[:, :H] + gh[:, :H])
            z = _sigmoid(gi[:, H:2 * H] + gh[:, H:2 * H])
            n = jnp.tanh(gi[:, 2 * H:] + r * gh[:, 2 * H:])
            h_new = (1.0 - z) * n + z * hl
            new_h.append(h_new)
            x = h_new
        h = jnp.stack(new_h, axis=0)
        outs.append(x.reshape(1, 1, H))
    return jnp.concatenate(outs, axis=0), h


if __name__ == "__main__":
    input_size = 16        # vocab
    embedding_size = 32
    hidden_size = 32
    num_layers = 2
    seq_len = 8

    key = jax.random.PRNGKey(0)
    params = init_params(key, input_size, embedding_size, hidden_size, num_layers)
    hidden0 = jnp.zeros((num_layers, 1, hidden_size), jnp.float32)   # initHidden

    # (a) Single-token step: exactly Encoder.forward(input, hidden).
    token = jnp.array([5], dtype=jnp.int32)
    out1, hid1 = encoder_forward(params, token, hidden0)
    out1 = jax.block_until_ready(out1)
    hid1 = jax.block_until_ready(hid1)
    out1_ref, hid1_ref = encoder_forward_ref(params, token, hidden0)
    assert out1.shape == (1, 1, hidden_size)
    assert hid1.shape == (num_layers, 1, hidden_size)
    assert jnp.allclose(out1, out1_ref, atol=5e-4, rtol=5e-4)
    assert jnp.allclose(hid1, hid1_ref, atol=5e-4, rtol=5e-4)

    # (b) Whole token sequence fused into one call (amortized launch/DMA).
    tokens = jax.random.randint(jax.random.PRNGKey(1), (seq_len,), 0, input_size,
                                dtype=jnp.int32)
    out, hid = encoder_forward(params, tokens, hidden0)
    out = jax.block_until_ready(out)
    hid = jax.block_until_ready(hid)
    out_ref, hid_ref = encoder_forward_ref(params, tokens, hidden0)
    assert out.shape == (seq_len, 1, hidden_size)
    assert hid.shape == (num_layers, 1, hidden_size)
    assert jnp.allclose(out, out_ref, atol=5e-4, rtol=5e-4)
    assert jnp.allclose(hid, hid_ref, atol=5e-4, rtol=5e-4)

    print("KERNEL_OK")
</pallas_src>

<mosaic_0001>
module attributes {stable_mosaic.version = 11 : i64} {
  func.func @kernel(%arg0: i32, %arg1: memref<1xi32, #tpu.memory_space<smem>>, %arg2: memref<2x1x32xf32, #tpu.memory_space<vmem>>, %arg3: memref<16x1x32xbf16, #tpu.memory_space<vmem>>, %arg4: memref<32x96xbf16, #tpu.memory_space<vmem>>, %arg5: memref<32x96xbf16, #tpu.memory_space<vmem>>, %arg6: memref<1x96xf32, #tpu.memory_space<vmem>>, %arg7: memref<1x96xf32, #tpu.memory_space<vmem>>, %arg8: memref<32x96xbf16, #tpu.memory_space<vmem>>, %arg9: memref<32x96xbf16, #tpu.memory_space<vmem>>, %arg10: memref<1x96xf32, #tpu.memory_space<vmem>>, %arg11: memref<1x96xf32, #tpu.memory_space<vmem>>, %arg12: memref<1x1x32xf32, #tpu.memory_space<vmem>>, %arg13: memref<2x1x32xf32, #tpu.memory_space<vmem>>) attributes {dimension_semantics = [#tpu.dimension_semantics<arbitrary>], iteration_bounds = array<i64: 1>, scalar_prefetch = 0 : i64, scratch_operands = 0 : i64, tpu.core_type = #tpu.core_type<tc>, window_params = [{transform_indices = @transform_0, window_bounds = array<i64: 1>}, {pipeline_mode = #tpu.pipeline_mode<synchronous>, transform_indices = @transform_1, window_bounds = array<i64: 2, 1, 32>}, {pipeline_mode = #tpu.pipeline_mode<synchronous>, transform_indices = @transform_2, window_bounds = array<i64: 16, 1, 32>}, {pipeline_mode = #tpu.pipeline_mode<synchronous>, transform_indices = @transform_3, window_bounds = array<i64: 32, 96>}, {pipeline_mode = #tpu.pipeline_mode<synchronous>, transform_indices = @transform_4, window_bounds = array<i64: 32, 96>}, {pipeline_mode = #tpu.pipeline_mode<synchronous>, transform_indices = @transform_5, window_bounds = array<i64: 1, 96>}, {pipeline_mode = #tpu.pipeline_mode<synchronous>, transform_indices = @transform_6, window_bounds = array<i64: 1, 96>}, {pipeline_mode = #tpu.pipeline_mode<synchronous>, transform_indices = @transform_7, window_bounds = array<i64: 32, 96>}, {pipeline_mode = #tpu.pipeline_mode<synchronous>, transform_indices = @transform_8, window_bounds = array<i64: 32, 96>}, {pipeline_mode = #tpu.pipeline_mode<synchronous>, transform_indices = @transform_9, window_bounds = array<i64: 1, 96>}, {pipeline_mode = #tpu.pipeline_mode<synchronous>, transform_indices = @transform_10, window_bounds = array<i64: 1, 96>}, {pipeline_mode = #tpu.pipeline_mode<synchronous>, transform_indices = @transform_11, window_bounds = array<i64: 1, 1, 32>}, {pipeline_mode = #tpu.pipeline_mode<synchronous>, transform_indices = @transform_12, window_bounds = array<i64: 2, 1, 32>}]} {
    %c0_i32 = arith.constant 0 : i32
    %0 = arith.cmpi eq, %arg0, %c0_i32 : i32
    %1 = arith.extui %0 : i1 to i32
    %c0_i32_0 = arith.constant 0 : i32
    %2 = arith.cmpi ne, %1, %c0_i32_0 : i32
    scf.if %2 {
      %c0_48 = arith.constant 0 : index
      %c0_49 = arith.constant 0 : index
      %c0_50 = arith.constant 0 : index
      %101 = vector.load %arg2[%c0_48, %c0_49, %c0_50] : memref<2x1x32xf32, #tpu.memory_space<vmem>>, vector<2x1x32xf32>
      %c0_51 = arith.constant 0 : index
      %c0_52 = arith.constant 0 : index
      %c0_53 = arith.constant 0 : index
      %102 = vector.load %arg13[%c0_51, %c0_52, %c0_53] : memref<2x1x32xf32, #tpu.memory_space<vmem>>, vector<2x1x32xf32>
      tpu.vector_store %arg13[%c0_51, %c0_52, %c0_53], %101 {strides = array<i32>} : memref<2x1x32xf32, #tpu.memory_space<vmem>>, vector<2x1x32xf32>,
    } else {
    }
    %3 = arith.index_cast %arg0 : i32 to index
    %4 = memref.load %arg1[%3] : memref<1xi32, #tpu.memory_space<smem>>
    %5 = arith.index_cast %4 : i32 to index
    %c0 = arith.constant 0 : index
    %c0_1 = arith.constant 0 : index
    %6 = vector.load %arg3[%5, %c0, %c0_1] : memref<16x1x32xbf16, #tpu.memory_space<vmem>>, vector<1x1x32xbf16>
    %7 = vector.shape_cast %6 : vector<1x1x32xbf16> to vector<1x32xbf16>
    %c0_2 = arith.constant 0 : index
    %c0_3 = arith.constant 0 : index
    %c0_4 = arith.constant 0 : index
    %8 = vector.load %arg13[%c0_2, %c0_3, %c0_4] : memref<2x1x32xf32, #tpu.memory_space<vmem>>, vector<1x1x32xf32>
    %9 = vector.shape_cast %8 : vector<1x1x32xf32> to vector<1x32xf32>
    %c0_5 = arith.constant 0 : index
    %c0_6 = arith.constant 0 : index
    %10 = vector.load %arg4[%c0_5, %c0_6] : memref<32x96xbf16, #tpu.memory_space<vmem>>, vector<32x96xbf16>
    %cst = arith.constant dense<0.000000e+00> : vector<1x96xf32>
    %11 = tpu.matmul %7, %10, %cst {dimension_numbers = #tpu.dot_dimension_numbers<[1], [0], [0], [1], [0, 0, 1, 1], [], []>} : vector<1x32xbf16>, vector<32x96xbf16>, vector<1x96xf32> -> vector<1x96xf32>
    %c0_7 = arith.constant 0 : index
    %c0_8 = arith.constant 0 : index
    %12 = vector.load %arg6[%c0_7, %c0_8] : memref<1x96xf32, #tpu.memory_space<vmem>>, vector<1x96xf32>
    %13 = arith.addf %11, %12 : vector<1x96xf32>
    %14 = arith.truncf %9 : vector<1x32xf32> to vector<1x32xbf16>
    %c0_9 = arith.constant 0 : index
    %c0_10 = arith.constant 0 : index
    %15 = vector.load %arg5[%c0_9, %c0_10] : memref<32x96xbf16, #tpu.memory_space<vmem>>, vector<32x96xbf16>
    %cst_11 = arith.constant dense<0.000000e+00> : vector<1x96xf32>
    %16 = tpu.matmul %14, %15, %cst_11 {dimension_numbers = #tpu.dot_dimension_numbers<[1], [0], [0], [1], [0, 0, 1, 1], [], []>} : vector<1x32xbf16>, vector<32x96xbf16>, vector<1x96xf32> -> vector<1x96xf32>
    %c0_12 = arith.constant 0 : index
    %c0_13 = arith.constant 0 : index
    %17 = vector.load %arg7[%c0_12, %c0_13] : memref<1x96xf32, #tpu.memory_space<vmem>>, vector<1x96xf32>
    %18 = arith.addf %16, %17 : vector<1x96xf32>
    %19 = vector.extract_strided_slice %13 {offsets = [0, 0], sizes = [1, 32], strides = [1, 1]} : vector<1x96xf32> to vector<1x32xf32>
    %20 = vector.extract_strided_slice %18 {offsets = [0, 0], sizes = [1, 32], strides = [1, 1]} : vector<1x96xf32> to vector<1x32xf32>
    %21 = arith.addf %19, %20 : vector<1x32xf32>
    %cst_14 = arith.constant 0.000000e+00 : f32
    %22 = vector.broadcast %cst_14 : f32 to vector<1x32xf32>
    %23 = arith.subf %22, %21 : vector<1x32xf32>
    %24 = math.exp %23 : vector<1x32xf32>
    %cst_15 = arith.constant 1.000000e+00 : f32
    %25 = vector.broadcast %cst_15 : f32 to vector<1x32xf32>
    %26 = arith.addf %25, %24 : vector<1x32xf32>
    %cst_16 = arith.constant 1.000000e+00 : f32
    %27 = vector.broadcast %cst_16 : f32 to vector<1x32xf32>
    %28 = arith.divf %27, %26 : vector<1x32xf32>
    %29 = vector.extract_strided_slice %13 {offsets = [0, 32], sizes = [1, 32], strides = [1, 1]} : vector<1x96xf32> to vector<1x32xf32>
    %30 = vector.extract_strided_slice %18 {offsets = [0, 32], sizes = [1, 32], strides = [1, 1]} : vector<1x96xf32> to vector<1x32xf32>
    %31 = arith.addf %29, %30 : vector<1x32xf32>
    %cst_17 = arith.constant 0.000000e+00 : f32
    %32 = vector.broadcast %cst_17 : f32 to vector<1x32xf32>
    %33 = arith.subf %32, %31 : vector<1x32xf32>
    %34 = math.exp %33 : vector<1x32xf32>
    %cst_18 = arith.constant 1.000000e+00 : f32
    %35 = vector.broadcast %cst_18 : f32 to vector<1x32xf32>
    %36 = arith.addf %35, %34 : vector<1x32xf32>
    %cst_19 = arith.constant 1.000000e+00 : f32
    %37 = vector.broadcast %cst_19 : f32 to vector<1x32xf32>
    %38 = arith.divf %37, %36 : vector<1x32xf32>
    %39 = vector.extract_strided_slice %13 {offsets = [0, 64], sizes = [1, 32], strides = [1, 1]} : vector<1x96xf32> to vector<1x32xf32>
    %40 = vector.extract_strided_slice %18 {offsets = [0, 64], sizes = [1, 32], strides = [1, 1]} : vector<1x96xf32> to vector<1x32xf32>
    %41 = arith.mulf %28, %40 : vector<1x32xf32>
    %42 = arith.addf %39, %41 : vector<1x32xf32>
    %43 = math.tanh %42 : vector<1x32xf32>
    %cst_20 = arith.constant 1.000000e+00 : f32
    %44 = vector.broadcast %cst_20 : f32 to vector<1x32xf32>
    %45 = arith.subf %44, %38 : vector<1x32xf32>
    %46 = arith.mulf %45, %43 : vector<1x32xf32>
    %47 = arith.mulf %38, %9 : vector<1x32xf32>
    %48 = arith.addf %46, %47 : vector<1x32xf32>
    %c0_21 = arith.constant 0 : index
    %c0_22 = arith.constant 0 : index
    %c0_23 = arith.constant 0 : index
    %49 = vector.load %arg13[%c0_21, %c0_22, %c0_23] : memref<2x1x32xf32, #tpu.memory_space<vmem>>, vector<1x1x32xf32>
    %50 = vector.shape_cast %49 : vector<1x1x32xf32> to vector<1x32xf32>
    %51 = vector.shape_cast %48 : vector<1x32xf32> to vector<1x1x32xf32>
    tpu.vector_store %arg13[%c0_21, %c0_22, %c0_23], %51 {strides = array<i32>} : memref<2x1x32xf32, #tpu.memory_space<vmem>>, vector<1x1x32xf32>,
    %52 = arith.truncf %48 : vector<1x32xf32> to vector<1x32xbf16>
    %c1 = arith.constant 1 : index
    %c0_24 = arith.constant 0 : index
    %c0_25 = arith.constant 0 : index
    %53 = vector.load %arg13[%c1, %c0_24, %c0_25] : memref<2x1x32xf32, #tpu.memory_space<vmem>>, vector<1x1x32xf32>
    %54 = vector.shape_cast %53 : vector<1x1x32xf32> to vector<1x32xf32>
    %c0_26 = arith.constant 0 : index
    %c0_27 = arith.constant 0 : index
    %55 = vector.load %arg8[%c0_26, %c0_27] : memref<32x96xbf16, #tpu.memory_space<vmem>>, vector<32x96xbf16>
    %cst_28 = arith.constant dense<0.000000e+00> : vector<1x96xf32>
    %56 = tpu.matmul %52, %55, %cst_28 {dimension_numbers = #tpu.dot_dimension_numbers<[1], [0], [0], [1], [0, 0, 1, 1], [], []>} : vector<1x32xbf16>, vector<32x96xbf16>, vector<1x96xf32> -> vector<1x96xf32>
    %c0_29 = arith.constant 0 : index
    %c0_30 = arith.constant 0 : index
    %57 = vector.load %arg10[%c0_29, %c0_30] : memref<1x96xf32, #tpu.memory_space<vmem>>, vector<1x96xf32>
    %58 = arith.addf %56, %57 : vector<1x96xf32>
    %59 = arith.truncf %54 : vector<1x32xf32> to vector<1x32xbf16>
    %c0_31 = arith.constant 0 : index
    %c0_32 = arith.constant 0 : index
    %60 = vector.load %arg9[%c0_31, %c0_32] : memref<32x96xbf16, #tpu.memory_space<vmem>>, vector<32x96xbf16>
    %cst_33 = arith.constant dense<0.000000e+00> : vector<1x96xf32>
    %61 = tpu.matmul %59, %60, %cst_33 {dimension_numbers = #tpu.dot_dimension_numbers<[1], [0], [0], [1], [0, 0, 1, 1], [], []>} : vector<1x32xbf16>, vector<32x96xbf16>, vector<1x96xf32> -> vector<1x96xf32>
    %c0_34 = arith.constant 0 : index
    %c0_35 = arith.constant 0 : index
    %62 = vector.load %arg11[%c0_34, %c0_35] : memref<1x96xf32, #tpu.memory_space<vmem>>, vector<1x96xf32>
    %63 = arith.addf %61, %62 : vector<1x96xf32>
    %64 = vector.extract_strided_slice %58 {offsets = [0, 0], sizes = [1, 32], strides = [1, 1]} : vector<1x96xf32> to vector<1x32xf32>
    %65 = vector.extract_strided_slice %63 {offsets = [0, 0], sizes = [1, 32], strides = [1, 1]} : vector<1x96xf32> to vector<1x32xf32>
    %66 = arith.addf %64, %65 : vector<1x32xf32>
    %cst_36 = arith.constant 0.000000e+00 : f32
    %67 = vector.broadcast %cst_36 : f32 to vector<1x32xf32>
    %68 = arith.subf %67, %66 : vector<1x32xf32>
    %69 = math.exp %68 : vector<1x32xf32>
    %cst_37 = arith.constant 1.000000e+00 : f32
    %70 = vector.broadcast %cst_37 : f32 to vector<1x32xf32>
    %71 = arith.addf %70, %69 : vector<1x32xf32>
    %cst_38 = arith.constant 1.000000e+00 : f32
    %72 = vector.broadcast %cst_38 : f32 to vector<1x32xf32>
    %73 = arith.divf %72, %71 : vector<1x32xf32>
    %74 = vector.extract_strided_slice %58 {offsets = [0, 32], sizes = [1, 32], strides = [1, 1]} : vector<1x96xf32> to vector<1x32xf32>
    %75 = vector.extract_strided_slice %63 {offsets = [0, 32], sizes = [1, 32], strides = [1, 1]} : vector<1x96xf32> to vector<1x32xf32>
    %76 = arith.addf %74, %75 : vector<1x32xf32>
    %cst_39 = arith.constant 0.000000e+00 : f32
    %77 = vector.broadcast %cst_39 : f32 to vector<1x32xf32>
    %78 = arith.subf %77, %76 : vector<1x32xf32>
    %79 = math.exp %78 : vector<1x32xf32>
    %cst_40 = arith.constant 1.000000e+00 : f32
    %80 = vector.broadcast %cst_40 : f32 to vector<1x32xf32>
    %81 = arith.addf %80, %79 : vector<1x32xf32>
    %cst_41 = arith.constant 1.000000e+00 : f32
    %82 = vector.broadcast %cst_41 : f32 to vector<1x32xf32>
    %83 = arith.divf %82, %81 : vector<1x32xf32>
    %84 = vector.extract_strided_slice %58 {offsets = [0, 64], sizes = [1, 32], strides = [1, 1]} : vector<1x96xf32> to vector<1x32xf32>
    %85 = vector.extract_strided_slice %63 {offsets = [0, 64], sizes = [1, 32], strides = [1, 1]} : vector<1x96xf32> to vector<1x32xf32>
    %86 = arith.mulf %73, %85 : vector<1x32xf32>
    %87 = arith.addf %84, %86 : vector<1x32xf32>
    %88 = math.tanh %87 : vector<1x32xf32>
    %cst_42 = arith.constant 1.000000e+00 : f32
    %89 = vector.broadcast %cst_42 : f32 to vector<1x32xf32>
    %90 = arith.subf %89, %83 : vector<1x32xf32>
    %91 = arith.mulf %90, %88 : vector<1x32xf32>
    %92 = arith.mulf %83, %54 : vector<1x32xf32>
    %93 = arith.addf %91, %92 : vector<1x32xf32>
    %c1_43 = arith.constant 1 : index
    %c0_44 = arith.constant 0 : index
    %c0_45 = arith.constant 0 : index
    %94 = vector.load %arg13[%c1_43, %c0_44, %c0_45] : memref<2x1x32xf32, #tpu.memory_space<vmem>>, vector<1x1x32xf32>
    %95 = vector.shape_cast %94 : vector<1x1x32xf32> to vector<1x32xf32>
    %96 = vector.shape_cast %93 : vector<1x32xf32> to vector<1x1x32xf32>
    tpu.vector_store %arg13[%c1_43, %c0_44, %c0_45], %96 {strides = array<i32>} : memref<2x1x32xf32, #tpu.memory_space<vmem>>, vector<1x1x32xf32>,
    %97 = arith.index_cast %arg0 : i32 to index
    %c0_46 = arith.constant 0 : index
    %c0_47 = arith.constant 0 : index
    %98 = vector.load %arg12[%97, %c0_46, %c0_47] : memref<1x1x32xf32, #tpu.memory_space<vmem>>, vector<1x1x32xf32>
    %99 = vector.shape_cast %98 : vector<1x1x32xf32> to vector<1x32xf32>
    %100 = vector.shape_cast %93 : vector<1x32xf32> to vector<1x1x32xf32>
    tpu.vector_store %arg12[%97, %c0_46, %c0_47], %100 {strides = array<i32>} : memref<1x1x32xf32, #tpu.memory_space<vmem>>, vector<1x1x32xf32>,
    return
  }
  func.func @transform_0(%arg0: i32) -> i32 {
    %c0_i32 = arith.constant 0 : i32
    %c0_i32_0 = arith.constant 0 : i32
    return %c0_i32 : i32
  }
  func.func @transform_1(%arg0: i32) -> (i32, i32, i32) {
    %c0_i32 = arith.constant 0 : i32
    %c0_i32_0 = arith.constant 0 : i32
    %c0_i32_1 = arith.constant 0 : i32
    %c0_i32_2 = arith.constant 0 : i32
    return %c0_i32, %c0_i32_0, %c0_i32_1 : i32, i32, i32
  }
  func.func @transform_2(%arg0: i32) -> (i32, i32, i32) {
    %c0_i32 = arith.constant 0 : i32
    %c0_i32_0 = arith.constant 0 : i32
    %c0_i32_1 = arith.constant 0 : i32
    %c0_i32_2 = arith.constant 0 : i32
    return %c0_i32, %c0_i32_0, %c0_i32_1 : i32, i32, i32
  }
  func.func @transform_3(%arg0: i32) -> (i32, i32) {
    %c0_i32 = arith.constant 0 : i32
    %c0_i32_0 = arith.constant 0 : i32
    %c0_i32_1 = arith.constant 0 : i32
    return %c0_i32, %c0_i32_0 : i32, i32
  }
  func.func @transform_4(%arg0: i32) -> (i32, i32) {
    %c0_i32 = arith.constant 0 : i32
    %c0_i32_0 = arith.constant 0 : i32
    %c0_i32_1 = arith.constant 0 : i32
    return %c0_i32, %c0_i32_0 : i32, i32
  }
  func.func @transform_5(%arg0: i32) -> (i32, i32) {
    %c0_i32 = arith.constant 0 : i32
    %c0_i32_0 = arith.constant 0 : i32
    %c0_i32_1 = arith.constant 0 : i32
    return %c0_i32, %c0_i32_0 : i32, i32
  }
  func.func @transform_6(%arg0: i32) -> (i32, i32) {
    %c0_i32 = arith.constant 0 : i32
    %c0_i32_0 = arith.constant 0 : i32
    %c0_i32_1 = arith.constant 0 : i32
    return %c0_i32, %c0_i32_0 : i32, i32
  }
  func.func @transform_7(%arg0: i32) -> (i32, i32) {
    %c0_i32 = arith.constant 0 : i32
    %c0_i32_0 = arith.constant 0 : i32
    %c0_i32_1 = arith.constant 0 : i32
    return %c0_i32, %c0_i32_0 : i32, i32
  }
  func.func @transform_8(%arg0: i32) -> (i32, i32) {
    %c0_i32 = arith.constant 0 : i32
    %c0_i32_0 = arith.constant 0 : i32
    %c0_i32_1 = arith.constant 0 : i32
    return %c0_i32, %c0_i32_0 : i32, i32
  }
  func.func @transform_9(%arg0: i32) -> (i32, i32) {
    %c0_i32 = arith.constant 0 : i32
    %c0_i32_0 = arith.constant 0 : i32
    %c0_i32_1 = arith.constant 0 : i32
    return %c0_i32, %c0_i32_0 : i32, i32
  }
  func.func @transform_10(%arg0: i32) -> (i32, i32) {
    %c0_i32 = arith.constant 0 : i32
    %c0_i32_0 = arith.constant 0 : i32
    %c0_i32_1 = arith.constant 0 : i32
    return %c0_i32, %c0_i32_0 : i32, i32
  }
  func.func @transform_11(%arg0: i32) -> (i32, i32, i32) {
    %c0_i32 = arith.constant 0 : i32
    %c0_i32_0 = arith.constant 0 : i32
    %c0_i32_1 = arith.constant 0 : i32
    %c0_i32_2 = arith.constant 0 : i32
    return %c0_i32, %c0_i32_0, %c0_i32_1 : i32, i32, i32
  }
  func.func @transform_12(%arg0: i32) -> (i32, i32, i32) {
    %c0_i32 = arith.constant 0 : i32
    %c0_i32_0 = arith.constant 0 : i32
    %c0_i32_1 = arith.constant 0 : i32
    %c0_i32_2 = arith.constant 0 : i32
    return %c0_i32, %c0_i32_0, %c0_i32_1 : i32, i32, i32
  }
}

</mosaic_0001>

<bundles_post_ra>
// kernel: tpu_custom_call.1
= control target key start
LH: loop header
LB: loop body
LE: loop exit
PB: predicated region body
PF: predicated region fallthrough
CT: control target
= control target key end

     0   :  { %19 = vsyncpa [#allocation4], 0  ;;  %s826_s0 = inlined_call_operand.<no memory space> [shape: s32[1], index: 0, kind: input, shape index: {}]   ;;  %s827_s1 = inlined_call_operand.hbm [shape: f32[2,1,32], index: 1, kind: input, shape index: {}, may-alias: {1,12}]   ;;  %s828_s2 = inlined_call_operand.vmem [shape: bf16[16,1,32], index: 2, kind: input, shape index: {}]   ;;  %s829_s3 = inlined_call_operand.vmem [shape: bf16[32,96], index: 3, kind: input, shape index: {}]   ;;  %s830_s4 = inlined_call_operand.vmem [shape: bf16[32,96], index: 4, kind: input, shape index: {}]   ;;  %s831_s5 = inlined_call_operand.vmem [shape: f32[1,96], index: 5, kind: input, shape index: {}]   ;;  %s832_s6 = inlined_call_operand.vmem [shape: f32[1,96], index: 6, kind: input, shape index: {}]   ;;  %s833_s7 = inlined_call_operand.hbm [shape: bf16[32,96], index: 7, kind: input, shape index: {}]   ;;  %s834_s8 = inlined_call_operand.hbm [shape: bf16[32,96], index: 8, kind: input, shape index: {}]   ;;  %s835_s9 = inlined_call_operand.vmem [shape: f32[1,96], index: 9, kind: input, shape index: {}]   ;;  %s836_s10 = inlined_call_operand.vmem [shape: f32[1,96], index: 10, kind: input, shape index: {}]   ;;  %s837_s11 = inlined_call_operand.hbm [shape: f32[1,1,32], index: 11, kind: output, shape index: {0}]   ;;  %s838_s12 = inlined_call_operand.hbm [shape: f32[2,1,32], index: 12, kind: output, shape index: {1}, may-alias: {1,12}]  }
   0x1   :  { %20 = vsyncpa [#allocation7], 0 }
   0x2   :  { %21 = vsyncpa [#allocation5], 0 }
   0x3   :  { %22 = vsyncpa [#allocation11], 0  ;;  %s657_s21 = smov [#allocation6]  }
   0x4   :  { %s52_s22 = sshll.u32 %s657_s21, 4  ;;  %s53_s22 = int_to_ptr.vmem [resolvable:$true] %s52_s22 }
   0x5   :  { %s557_s23 = scalar_lea.vmem %s53_s22, 256  ;;  %p562_p1 = scmp.lt.s32.totalorder %s53_s22, %s53_s22 }
   0x6   :  { %p558_p0 = scmp.ne.s32.totalorder %s53_s22, %s557_s23  ;;  %p563_p2 = scmp.lt.s32.totalorder %s557_s23, %s557_s23 }
   0x8   :  { %p564_p3 = por %p563_p2, %p562_p1 }
   0xa   :  { %p565_p4 = pnand %p564_p3, %p558_p0 }
   0xc   :  { %568 = shalt.err (!%p565_p4)
}
   0xd   :  { %s658_s24 = smov 64   ;;  %s659_s25 = smov 4  }
   0xe   :  { %58 = dma.hbm_to_vmem [thread:$0]  %s833_s7, 256, %s53_s22, [#allocation7], %s658_s24, %s658_s24, %s659_s25  }
   0xf   :  { %s660_s28 = smov [#allocation3]  }
  0x10   :  { %s30_s29 = sshll.u32 %s660_s28, 4  ;;  %s31_s29 = int_to_ptr.vmem [resolvable:$true] %s30_s29 }
  0x11   :  { %s577_s30 = scalar_lea.vmem %s31_s29, 32  ;;  %p582_p6 = scmp.lt.s32.totalorder %s31_s29, %s31_s29 }
  0x12   :  { %p578_p5 = scmp.ne.s32.totalorder %s31_s29, %s577_s30  ;;  %p583_p7 = scmp.lt.s32.totalorder %s577_s30, %s577_s30 }
  0x14   :  { %p584_p8 = por %p583_p7, %p582_p6 }
  0x16   :  { %p585_p9 = pnand %p584_p8, %p578_p5 }
  0x18   :  { %588 = shalt.err (!%p585_p9)
}
  0x19   :  { %s661_s13 = smov 16   ;;  %s662_s14 = smov 1  }
  0x1a   :  { %36 = dma.hbm_to_vmem [thread:$0]  %s827_s1, 32, %s31_s29, [#allocation4], %s661_s13, %s661_s13, %s662_s14  }
  0x1b   :  { %s663_s7 = smov [#allocation8]  }
  0x1c   :  { %s64_s17 = sshll.u32 %s663_s7, 4  ;;  %s65_s17 = int_to_ptr.vmem [resolvable:$true] %s64_s17 }
  0x1d   :  { %s597_s18 = scalar_lea.vmem %s65_s17, 256  ;;  %p602_p11 = scmp.lt.s32.totalorder %s65_s17, %s65_s17 }
  0x1e   :  { %p598_p10 = scmp.ne.s32.totalorder %s65_s17, %s597_s18  ;;  %p603_p12 = scmp.lt.s32.totalorder %s597_s18, %s597_s18 }
  0x20   :  { %p604_p13 = por %p603_p12, %p602_p11 }
  0x22   :  { %p605_p0 = pnand %p604_p13, %p598_p10 }
  0x24   :  { %608 = shalt.err (!%p605_p0)
}
  0x25   :  { %70 = dma.hbm_to_vmem [thread:$0]  %s834_s8, 256, %s65_s17, [#allocation7], %s658_s24, %s658_s24, %s659_s25  }
  0x26   :  { %649 = dma.done.wait [#allocation4], 32  }
  0x27   :  { %650 = vsyncadd [#allocation4], 4294967264 }
  0x28   :  { %651 = dma.done.wait [#allocation7], 512  }
  0x29   :  { %652 = vsyncadd [#allocation7], 4294966784  ;;  %v664_v0 = vmov 0.0   ;;  %vm665_vm0 = vmmov 0   ;;  %v529_v1 = vld [vmem:[%s829_s3 + $0x8] sm:$0xff]   ;;  %s95_s28 = scalar_lea.vmem %s828_s2, %s826_s0  ;;  %v531_v3 = vld [vmem:[%s829_s3] sm:$0xff]   ;;  %v245_v31 = vlaneseq }
  0x2a   :  { %484 = vmatprep.subr.bf16.mxu0 %v664_v0  ;;  %492 = vmatprep.subr.bf16.mxu1 %v664_v0  ;;  %v530_v2 = vld [vmem:[%s830_s4 + $0x8] sm:$0xff]   ;;  %vm91_vm1 = vcmask 253952   ;;  %v532_v4 = vld [vmem:[%s830_s4] sm:$0xff]   ;;  %vm115_vm2 = vcmask 261120   ;;  %v534_v38 = vld [vmem:[#allocation8] sm:$0xff]  }
  0x2b   :  { %488 = vmatprep.mubr.msk.bf16.mxu0 %vm665_vm0, %v664_v0  ;;  %496 = vmatprep.mubr.msk.bf16.mxu1 %vm665_vm0, %v664_v0  ;;  %v96_v5 = vld [vmem:[%s95_s28] sm:$0x1]  ;;  %v246_v32 = vshrl.u32 %v245_v31, 7  ;;  %v90_v35 = vld [vmem:[#allocation3 + $0x1] sm:$0x1]  ;;  %v535_v36 = vld [vmem:[#allocation6 + $0x8] sm:$0xff]  }
  0x2c   :  { %485 = vmatpush3.bf16.msra.mxu0 %v529_v1  ;;  %493 = vmatpush3.bf16.msra.mxu1 %v530_v2  ;;  %v89_v6 = vld [vmem:[#allocation3] sm:$0x1]  ;;  %93 = vst.msk [vmem:[#allocation10 + $0x1] sm:$0x1] %vm91_vm1, %v90_v35  ;;  %v536_v40 = vld [vmem:[#allocation6] sm:$0xff]  }
  0x2d   :  { %486 = vmatprep.subr.bf16.mxu0 %v664_v0  ;;  %494 = vmatprep.subr.bf16.mxu1 %v664_v0  ;;  %92 = vst.msk [vmem:[#allocation10] sm:$0x1] %vm91_vm1, %v89_v6  ;;  %v164_v11 = vld [vmem:[%s832_s6] sm:$0x1]  ;;  %v247_v33 = vsub.s32 0, %v246_v32  ;;  %s667_s6 = smov 32  }
  0x2e   :  { %v102_v19 = vld [vmem:[%s831_s5] sm:$0x1]  ;;  %s666_s5 = smov 96  }
  0x2f   :  { %v533_v34 = vld [vmem:[#allocation8 + $0x8] sm:$0xff]  }
  0x30   :  { %487 = vmatpush3.bf16.msra.mxu0 %v531_v3  ;;  %495 = vmatpush3.bf16.msra.mxu1 %v532_v4  ;;  %v331_v50 = vld [vmem:[%s836_s10] sm:$0x1] }
  0x31   :  { %500 = vmatprep.subr.bf16.mxu0 %v664_v0  ;;  %508 = vmatprep.subr.bf16.mxu1 %v664_v0  ;;  %v267_v57 = vld [vmem:[%s835_s9] sm:$0x1]  ;;  %s668_s9 = smov [#allocation9]  }
  0x32   :  { %s433_s10 = sshll.u32 %s668_s9, 4  ;;  %s434_s10 = int_to_ptr.vmem [resolvable:$true] %s433_s10 }
  0x33   :  { %489 = vmatmul.mubr.msk.bf16.vlgmr.msra.gmra.mxu0 %vm115_vm2, %v96_v5  ;;  %v262_v41 = vld [vmem:[#allocation10 + $0x1] sm:$0x1]  ;;  %s609_s1 = scalar_lea.vmem %s434_s10, 16  ;;  %s613_s21 = scalar_lea.vmem %s434_s10, 32 }
  0x34   :  { %504 = vmatprep.mubr.msk.bf16.mxu0 %vm665_vm0, %v664_v0  ;;  %v97_v7 = vld [vmem:[#allocation10] sm:$0x1]  ;;  %501 = vmatpush3.bf16.msra.mxu0 %v535_v36  ;;  %v326_v42 = vpack.c.bf16 %v262_v41, %v262_v41  ;;  %p610_p1 = scmp.ne.s32.totalorder %s434_s10, %s609_s1  ;;  %p614_p2 = scmp.lt.s32.totalorder %s434_s10, %s434_s10 }
  0x35   :  { %v159_v8 = vpack.c.bf16 %v97_v7, %v97_v7  ;;  %v248_v39 = vrot.slane %v97_v7, %v247_v33  ;;  %502 = vmatprep.subr.bf16.mxu0 %v664_v0  ;;  %v415_v7 = vrot.slane %v262_v41, %v247_v33  ;;  %p615_p3 = scmp.lt.s32.totalorder %s613_s21, %s609_s1 }
  0x37   :  { %497 = vmatmul.mubr.msk.bf16.vlgmr.msra.gmra.mxu1 %vm115_vm2, %v159_v8  ;;  %p616_p4 = por %p615_p3, %p614_p2 }
  0x38   :  { %512 = vmatprep.mubr.msk.bf16.mxu1 %vm665_vm0, %v664_v0  ;;  %509 = vmatpush3.bf16.msra.mxu1 %v533_v34 }
  0x39   :  { %510 = vmatprep.subr.bf16.mxu1 %v664_v0  ;;  %503 = vmatpush3.bf16.msra.mxu0 %v536_v40  ;;  %p617_p5 = pnand %p616_p4, %p610_p1 }
  0x3c   :  { %511 = vmatpush3.bf16.msra.mxu1 %v534_v38 }
  0x3f   :  { %513 = vmatmul.mubr.msk.bf16.vlgmr.msra.gmra.mxu1 %vm115_vm2, %v326_v42 }
  0xf3   :  { %v153_v9 = vpop.f32.mrf.mxu0 }
  0xf4   :  { %v154_v20 = vadd.f32 %v153_v9, %v102_v19 }
  0xf5   :  { %v490_v10 = vpop.f32.mrf.mxu0 }
  0xf7   :  { %v156_v12 = vpop.f32.mrf.mxu0  ;;  %v214_v13 = vpop.f32.mrf.mxu1 }
  0xf8   :  { %v215_v15 = vadd.f32 %v214_v13, %v164_v11 }
  0xf9   :  { %v491_v14 = vpop.f32.mrf.mxu0  ;;  %v498_v16 = vpop.f32.mrf.mxu1 }
  0xfa   :  { %228 = vrot.lane.b32.xlu0 %v215_v15, %s658_s24  ;;  %v220_v21 = vadd.f32 %v215_v15, %v154_v20 }
  0xfb   :  { %v217_v17 = vpop.f32.mrf.mxu1 }
  0xfc   :  { %v221_v22 = vsub.f32 0.0, %v220_v21 }
  0xfd   :  { %v499_v18 = vpop.f32.mrf.mxu1 }
  0xfe   :  { %v222_v23 = vmul.f32 1.442695, %v221_v22 }
  0xff   :  { %v381_v51 = vpop.f32.mrf.mxu1 }
 0x100   :  { %537 = vpow2.f32 %v222_v23  ;;  %v382_v52 = vadd.f32 %v381_v51, %v331_v50 }
 0x101   :  { %v514_v53 = vpop.f32.mrf.mxu1 }
 0x103   :  { %v384_v54 = vpop.f32.mrf.mxu1 }
 0x105   :  { %v515_v55 = vpop.f32.mrf.mxu1 }
 0x10d   :  { %v538_v24 = vpop.eup %537 }
 0x10e   :  { %v224_v25 = vadd.f32 1.0, %v538_v24 }
 0x110   :  { %539 = vrcp.f32 %v224_v25 }
 0x11d   :  { %v540_v26 = vpop.eup %539 }
 0x11e   :  { %v238_v44 = vsub.f32 1.0, %v540_v26 }
 0x16c   :  { %v229_v27 = vpop.permute.xlu0 %228 }
 0x16d   :  { %v231_v28 = vmul.f32 %v540_v26, %v229_v27 }
 0x16f   :  { %233 = vrot.lane.b32.xlu0 %v231_v28, %s658_s24 }
 0x1e1   :  { %v234_v29 = vpop.permute.xlu0 %233 }
 0x1e2   :  { %v236_v30 = vadd.f32 %v234_v29, %v154_v20 }
 0x1e4   :  { %541 = vtanh.f32 %v236_v30 }
 0x1f1   :  { %v542_v37 = vpop.eup %541 }
 0x1f2   :  { %240 = vrot.lane.b32.xlu1 %v542_v37, %s666_s5 }
 0x1f6   :  { %249 = vrot.lane.b32.xlu1 %v248_v39, %s667_s6 }
 0x1fa   :  { %395 = vrot.lane.b32.xlu1 %v382_v52, %s658_s24 }
 0x264   :  { %v241_v43 = vpop.permute.xlu1 %240 }
 0x265   :  { %v243_v46 = vmul.f32 %v241_v43, %v238_v44 }
 0x268   :  { %v250_v45 = vpop.permute.xlu1 %249 }
 0x269   :  { %v252_v47 = vmul.f32 %v540_v26, %v250_v45 }
 0x26b   :  { %v253_v48 = vadd.f32 %v252_v47, %v243_v46 }
 0x26c   :  { %v396_v4 = vpop.permute.xlu1 %395 }
 0x26d   :  { %v260_v49 = vpack.c.bf16 %v253_v48, %v253_v48 }
 0x26f   :  { %269 = vrot.lane.b32.xlu0 %v260_v49, %s666_s5 }
 0x2e1   :  { %v270_v56 = vpop.permute.xlu0 %269 }
 0x2e2   :  { %505 = vmatmul.mubr.msk.bf16.vlgmr.msra.gmra.mxu0 %vm115_vm2, %v270_v56 }
 0x3a2   :  { %v320_v58 = vpop.f32.mrf.mxu0 }
 0x3a3   :  { %v321_v59 = vadd.f32 %v320_v58, %v267_v57 }
 0x3a4   :  { %v506_v60 = vpop.f32.mrf.mxu0 }
 0x3a5   :  { %v387_v61 = vadd.f32 %v382_v52, %v321_v59 }
 0x3a6   :  { %v323_v62 = vpop.f32.mrf.mxu0 }
 0x3a7   :  { %v388_v63 = vsub.f32 0.0, %v387_v61 }
 0x3a8   :  { %v507_v0 = vpop.f32.mrf.mxu0 }
 0x3a9   :  { %v389_v1 = vmul.f32 1.442695, %v388_v63 }
 0x3ab   :  { %543 = vpow2.f32 %v389_v1 }
 0x3b8   :  { %v544_v2 = vpop.eup %543 }
 0x3b9   :  { %v391_v3 = vadd.f32 1.0, %v544_v2 }
 0x3bb   :  { %545 = vrcp.f32 %v391_v3 }
 0x3c8   :  { %v546_v5 = vpop.eup %545 }
 0x3c9   :  { %v398_v6 = vmul.f32 %v546_v5, %v396_v4  ;;  %v405_v12 = vsub.f32 1.0, %v546_v5 }
 0x3cb   :  { %400 = vrot.lane.b32.xlu0 %v398_v6, %s658_s24  ;;  %s669_s24 = smov [#allocation10]  }
 0x3cc   :  { %s442_s20 = sshll.u32 %s669_s24, 4  ;;  %s443_s20 = int_to_ptr.vmem [resolvable:$true] %s442_s20 }
 0x3cf   :  { %416 = vrot.lane.b32.xlu0 %v415_v7, %s667_s6 }
 0x43d   :  { %v401_v8 = vpop.permute.xlu0 %400 }
 0x43e   :  { %v403_v9 = vadd.f32 %v401_v8, %v321_v59 }
 0x440   :  { %547 = vtanh.f32 %v403_v9 }
 0x441   :  { %v417_v11 = vpop.permute.xlu0 %416 }
 0x442   :  { %v419_v14 = vmul.f32 %v546_v5, %v417_v11 }
 0x44d   :  { %v548_v10 = vpop.eup %547 }
 0x44e   :  { %407 = vrot.lane.b32.xlu1 %v548_v10, %s666_s5 }
 0x452   :  { %255 = vrot.lane.b32.xlu1 %v253_v48, %s666_s5 }
 0x4c0   :  { %v408_v13 = vpop.permute.xlu1 %407 }
 0x4c1   :  { %v410_v15 = vmul.f32 %v408_v13, %v405_v12 }
 0x4c3   :  { %v420_v16 = vadd.f32 %v419_v14, %v410_v15 }
 0x4c4   :  { %v256_v17 = vpop.permute.xlu1 %255 }
 0x4c5   :  { %259 = vst.msk [vmem:[#allocation10] sm:$0x1] %vm91_vm1, %v256_v17  ;;  %422 = vrot.lane.b32.xlu0 %v420_v16, %s666_s5 }
 0x537   :  { %v423_v18 = vpop.permute.xlu0 %422 }
 0x538   :  { %425 = vst.msk [vmem:[#allocation10 + $0x1] sm:$0x1] %vm91_vm1, %v423_v18  ;;  %426 = vst.msk [vmem:[#allocation9] sm:$0x1] %vm91_vm1, %v423_v18 }
 0x539   :  { %620 = shalt.err (!%p617_p5)
}
 0x53a   :  { %436 = dma.vmem_to_hbm [thread:$0]  %s434_s10, 16, %s837_s11, [#allocation5]  }
 0x53b   :  { %s629_s23 = scalar_lea.vmem %s443_s20, 32  ;;  %p634_p7 = scmp.lt.s32.totalorder %s443_s20, %s443_s20 }
 0x53c   :  { %p630_p6 = scmp.ne.s32.totalorder %s443_s20, %s629_s23  ;;  %p635_p8 = scmp.lt.s32.totalorder %s629_s23, %s629_s23 }
 0x53e   :  { %p636_p9 = por %p635_p8, %p634_p7 }
 0x540   :  { %p637_p10 = pnand %p636_p9, %p630_p6 }
 0x542   :  { %640 = shalt.err (!%p637_p10)
}
 0x543   :  { %448 = dma.vmem_to_hbm [thread:$0]  %s443_s20, 32, %s838_s12, [#allocation11], %s661_s13, %s661_s13, %s662_s14  }
 0x544   :  { %653 = dma.done.wait [#allocation5], 16  }
 0x545   :  { %654 = vsyncadd [#allocation5], 4294967280 }
 0x546   :  { %655 = dma.done.wait [#allocation11], 32  }
 0x547   :  { %656 = vsyncadd [#allocation11], 4294967264 }
 0x548   :  { %455 = vsyncpa [#allocation4], 1 }
 0x549   :  { %456 = vsyncpa [#allocation7], 1 }
 0x54a   :  { %457 = vsyncpa [#allocation5], 1 }
 0x54b   :  { %458 = vsyncpa [#allocation11], 1 }

</bundles_post_ra>
